<compile_context>
chip_gen: v5e
topology: v5e:2x2
jax: 0.10.0
libtpu: 0.0.40
codegen_flags: <defaults>
</compile_context>

<pallas_src>
import functools

import jax
import jax.numpy as jnp
from jax import lax
from jax.experimental import pallas as pl
from jax.experimental.pallas import tpu as pltpu


# ----------------------------------------------------------------------------
# Pallas kernels
# ----------------------------------------------------------------------------

def _conv_mm_kernel(x_ref, w_ref, scale_ref, bias_ref, *rest, act):
    """One (M, N, K)-tile of the im2col conv matmul with fused BN affine / PReLU.

    Grid = (row_tiles, cout_tiles, taps); the tap axis is the K reduction
    (accumulated into an f32 VMEM scratch, stored on the last tap).
    """
    if act == "prelu":
        slope_ref, o_ref, acc_ref = rest
    else:
        o_ref, acc_ref = rest
        slope_ref = None

    t = pl.program_id(2)

    @pl.when(t == 0)
    def _():
        acc_ref[...] = jnp.zeros_like(acc_ref)

    # bf16 x bf16 -> f32 accumulation on the MXU.
    acc_ref[...] += jnp.dot(x_ref[0], w_ref[0], preferred_element_type=jnp.float32)

    @pl.when(t == pl.num_programs(2) - 1)
    def _():
        y = acc_ref[...] * scale_ref[...] + bias_ref[...]
        if act == "prelu":
            y = jnp.where(y >= 0.0, y, y * slope_ref[...])
        o_ref[...] = y.astype(o_ref.dtype)


@functools.partial(jax.jit, static_argnames=("act",))
def conv_mm(patches, w, scale, bias, slope=None, *, act="none"):
    """Fused conv matmul.

    patches: (T, R, Cin) bf16   (T taps; T=9 for 3x3 convs, T=1 for 1x1 / folded taps)
    w:       (T, Cin, Cout) bf16
    scale/bias/slope: (1, Cout) f32   (eval BN affine + optional PReLU slope)
    returns: (R, Cout) bf16
    """
    T, R, Cin = patches.shape
    Cout = w.shape[2]

    # --- M (row) tiling: 256-row blocks, pad the tail so the grid divides evenly.
    if R >= 256:
        tile_m = 256
        Rp = ((R + 255) // 256) * 256
    else:
        Rp = ((R + 7) // 8) * 8
        tile_m = Rp
    if Rp != R:
        patches = jnp.pad(patches, ((0, 0), (0, Rp - R), (0, 0)))

    # --- N (output channel) tiling: 256 fills the 2x256 MXU on v6e/v7x; 64/128-channel
    #     layers use the full channel dim.  (On v5e 128 would already fill the array.)
    ct = Cout if Cout <= 128 else (256 if Cout % 256 == 0 else 128)

    grid = (Rp // tile_m, Cout // ct, T)

    in_specs = [
        pl.BlockSpec((1, tile_m, Cin), lambda i, j, t: (t, i, 0)),
        pl.BlockSpec((1, Cin, ct), lambda i, j, t: (t, 0, j)),
        pl.BlockSpec((1, ct), lambda i, j, t: (0, j)),
        pl.BlockSpec((1, ct), lambda i, j, t: (0, j)),
    ]
    args = [patches, w, scale, bias]
    if act == "prelu":
        in_specs.append(pl.BlockSpec((1, ct), lambda i, j, t: (0, j)))
        args.append(slope)

    out = pl.pallas_call(
        functools.partial(_conv_mm_kernel, act=act),
        grid=grid,
        in_specs=in_specs,
        out_specs=pl.BlockSpec((tile_m, ct), lambda i, j, t: (i, j)),
        out_shape=jax.ShapeDtypeStruct((Rp, Cout), jnp.bfloat16),
        scratch_shapes=[pltpu.VMEM((tile_m, ct), jnp.float32)],
        # Tiles are ~2 MB/step: fits the default scoped VMEM on v5e/v6e/v7x, so no
        # vmem_limit override (v7x only has 64 MiB physical VMEM).
        compiler_params=pltpu.CompilerParams(
            dimension_semantics=("parallel", "parallel", "arbitrary")),
    )(*args)
    return out[:R] if Rp != R else out


def _se_gate_kernel(r_ref, w1_ref, w2_ref, a_ref, *, inv_hw):
    """Tiled global-average-pool accumulation; fc1/relu/fc2/sigmoid on the last HW tile."""
    hw = pl.program_id(1)

    @pl.when(hw == 0)
    def _():
        a_ref[...] = jnp.zeros_like(a_ref)

    part = jnp.sum(r_ref[0].astype(jnp.float32), axis=0, keepdims=True)   # (1, C)
    a_ref[0] += part

    @pl.when(hw == pl.num_programs(1) - 1)
    def _():
        m = a_ref[0] * inv_hw                                             # (1, C)
        h = jnp.maximum(jnp.dot(m, w1_ref[...],
                                preferred_element_type=jnp.float32), 0.0)
        g = jax.nn.sigmoid(jnp.dot(h, w2_ref[...],
                                   preferred_element_type=jnp.float32))
        a_ref[0] = g


def _se_apply_kernel(r_ref, sc_ref, a_ref, o_ref):
    """Streaming SE scaling + residual add: out = r * gate + shortcut."""
    gate = a_ref[...]                                                     # (1, 1, C) f32
    y = r_ref[...].astype(jnp.float32) * gate + sc_ref[...].astype(jnp.float32)
    o_ref[...] = y.astype(o_ref.dtype)


def _pick_hw_tile(hw):
    """Largest divisor of HW that is <= 1024 and sublane friendly (or HW itself)."""
    if hw <= 1024:
        return hw
    for cand in range(1024, 0, -1):
        if hw % cand == 0 and cand % 8 == 0:
            return cand
    return hw


@jax.jit
def se_gate(r, w1, w2):
    """r: (N, HW, C) bf16 -> sigmoid gate (N, 1, C) f32."""
    N, HW, C = r.shape
    Cr = w1.shape[1]
    thw = _pick_hw_tile(HW)
    return pl.pallas_call(
        functools.partial(_se_gate_kernel, inv_hw=1.0 / HW),
        grid=(N, HW // thw),
        in_specs=[
            pl.BlockSpec((1, thw, C), lambda n, h: (n, h, 0)),
            pl.BlockSpec((C, Cr), lambda n, h: (0, 0)),
            pl.BlockSpec((Cr, C), lambda n, h: (0, 0)),
        ],
        out_specs=pl.BlockSpec((1, 1, C), lambda n, h: (n, 0, 0)),
        out_shape=jax.ShapeDtypeStruct((N, 1, C), jnp.float32),
        compiler_params=pltpu.CompilerParams(
            dimension_semantics=("parallel", "arbitrary")),
    )(r, w1, w2)


@jax.jit
def se_apply(r, sc, gate):
    """out = r * gate + sc, tiled over (N, HW)."""
    N, HW, C = r.shape
    thw = _pick_hw_tile(HW)
    return pl.pallas_call(
        _se_apply_kernel,
        grid=(N, HW // thw),
        in_specs=[
            pl.BlockSpec((1, thw, C), lambda n, h: (n, h, 0)),
            pl.BlockSpec((1, thw, C), lambda n, h: (n, h, 0)),
            pl.BlockSpec((1, 1, C), lambda n, h: (n, 0, 0)),
        ],
        out_specs=pl.BlockSpec((1, thw, C), lambda n, h: (n, h, 0)),
        out_shape=jax.ShapeDtypeStruct((N, HW, C), jnp.bfloat16),
        compiler_params=pltpu.CompilerParams(
            dimension_semantics=("parallel", "parallel")),
    )(r, sc, gate)


# ----------------------------------------------------------------------------
# JAX glue: patch extraction, parameters, network structure (IR-SE-50)
# ----------------------------------------------------------------------------

def conv3x3_patches(x, stride):
    """x: (N, H, W, C) NHWC; 3x3 conv, pad=1 -> per-tap patches (9, N*Ho*Wo, C)."""
    N, H, W, C = x.shape
    Ho = (H - 1) // stride + 1
    Wo = (W - 1) // stride + 1
    xp = jnp.pad(x, ((0, 0), (1, 1), (1, 1), (0, 0)))
    taps = []
    for dh in range(3):
        for dw in range(3):
            t = lax.slice(
                xp, (0, dh, dw, 0),
                (N, dh + (Ho - 1) * stride + 1, dw + (Wo - 1) * stride + 1, C),
                (1, stride, stride, 1))
            taps.append(t.reshape(N * Ho * Wo, C))
    return jnp.stack(taps, axis=0), (N, Ho, Wo)


def conv3x3_patches_folded(x, stride):
    """Same, but taps folded into the K dim: (1, N*Ho*Wo, 9*C).  For tiny Cin (input layer)."""
    N, H, W, C = x.shape
    Ho = (H - 1) // stride + 1
    Wo = (W - 1) // stride + 1
    xp = jnp.pad(x, ((0, 0), (1, 1), (1, 1), (0, 0)))
    cols = []
    for dh in range(3):
        for dw in range(3):
            cols.append(lax.slice(
                xp, (0, dh, dw, 0),
                (N, dh + (Ho - 1) * stride + 1, dw + (Wo - 1) * stride + 1, C),
                (1, stride, stride, 1)))
    p = jnp.stack(cols, axis=3)                                # (N, Ho, Wo, 9, C)
    return p.reshape(1, N * Ho * Wo, 9 * C), (N, Ho, Wo)


def _bn_affine(key, c):
    """Eval-mode BatchNorm folded into per-channel scale/bias (f32)."""
    k1, k2, k3, k4 = jax.random.split(key, 4)
    gamma = 1.0 + 0.1 * jax.random.normal(k1, (c,), jnp.float32)
    beta = 0.1 * jax.random.normal(k2, (c,), jnp.float32)
    mean = 0.1 * jax.random.normal(k3, (c,), jnp.float32)
    var = jax.random.uniform(k4, (c,), jnp.float32, 0.5, 1.5)
    scale = gamma * lax.rsqrt(var + 1e-5)
    bias = beta - mean * scale
    return scale.reshape(1, c), bias.reshape(1, c)


def _blocks_config_50():
    cfg = []
    for in_c, depth, num in [(64, 64, 3), (64, 128, 4), (128, 256, 14), (256, 512, 3)]:
        cfg.append((in_c, depth, 2))
        cfg += [(depth, depth, 1)] * (num - 1)
    return cfg                                                 # 24 bottleneck_IR_SE blocks


def make_params(key):
    keys = iter(jax.random.split(key, 512))
    nk = lambda: next(keys)
    params = {}

    # input_layer: Conv2d(3,64,3,1,1,no-bias) + BN(64) + PReLU(64); taps folded (K=27).
    w = jax.random.normal(nk(), (3, 3, 3, 64), jnp.float32) / jnp.sqrt(27.0)
    s, b = _bn_affine(nk(), 64)
    slope = (0.25 + 0.02 * jax.random.normal(nk(), (64,), jnp.float32)).reshape(1, 64)
    params["input"] = dict(w=w.reshape(1, 27, 64).astype(jnp.bfloat16),
                           scale=s, bias=b, slope=slope)

    blocks = []
    for in_c, depth, _ in _blocks_config_50():
        p = {}
        p["bn1"] = _bn_affine(nk(), in_c)
        w1 = jax.random.normal(nk(), (3, 3, in_c, depth), jnp.float32) / jnp.sqrt(9.0 * in_c)
        p["conv1_w"] = w1.reshape(9, in_c, depth).astype(jnp.bfloat16)
        p["prelu"] = (0.25 + 0.02 * jax.random.normal(nk(), (depth,), jnp.float32)).reshape(1, depth)
        w2 = jax.random.normal(nk(), (3, 3, depth, depth), jnp.float32) / jnp.sqrt(9.0 * depth)
        p["conv2_w"] = w2.reshape(9, depth, depth).astype(jnp.bfloat16)
        p["bn2"] = _bn_affine(nk(), depth)
        cr = depth // 16
        p["se_w1"] = jax.random.normal(nk(), (depth, cr), jnp.float32) / jnp.sqrt(float(depth))
        p["se_w2"] = jax.random.normal(nk(), (cr, depth), jnp.float32) / jnp.sqrt(float(cr))
        if in_c == depth:
            p["shortcut"] = None                               # MaxPool2d(1, stride) shortcut
        else:
            ws = jax.random.normal(nk(), (in_c, depth), jnp.float32) / jnp.sqrt(float(in_c))
            p["shortcut"] = dict(w=ws.reshape(1, in_c, depth).astype(jnp.bfloat16),
                                 bn=_bn_affine(nk(), depth))
        blocks.append(p)
    params["blocks"] = blocks
    return params


@jax.jit
def input_layer_forward(x, p):
    patches, (N, Ho, Wo) = conv3x3_patches_folded(x, 1)
    y = conv_mm(patches, p["w"], p["scale"], p["bias"], p["slope"], act="prelu")
    return y.reshape(N, Ho, Wo, p["w"].shape[-1])


@functools.partial(jax.jit, static_argnames=("stride",))
def block_forward(x, p, *, stride):
    N, H, W, Cin = x.shape
    C = p["conv1_w"].shape[2]

    # --- shortcut branch: MaxPool2d(kernel=1, stride) == subsample, or 1x1 conv + BN ---
    xs = x[:, ::stride, ::stride, :]
    Ho, Wo = xs.shape[1], xs.shape[2]
    if p["shortcut"] is None:
        sc = xs
    else:
        sbn_s, sbn_b = p["shortcut"]["bn"]
        scp = xs.reshape(1, N * Ho * Wo, Cin)
        sc = conv_mm(scp, p["shortcut"]["w"], sbn_s, sbn_b,
                     act="none").reshape(N, Ho, Wo, C)

    # --- residual branch: BN -> Conv3x3 -> PReLU -> Conv3x3(stride) -> BN -> SE ---
    # bn1 is folded into the patch-extraction glue (fused by XLA): no standalone BN kernel.
    bn1_s, bn1_b = p["bn1"]
    xb = (x.astype(jnp.float32) * bn1_s.reshape(1, 1, 1, Cin)
          + bn1_b.reshape(1, 1, 1, Cin)).astype(jnp.bfloat16)

    ones_c = jnp.ones((1, C), jnp.float32)
    zeros_c = jnp.zeros((1, C), jnp.float32)

    p1, _ = conv3x3_patches(xb, 1)
    r = conv_mm(p1, p["conv1_w"], ones_c, zeros_c, p["prelu"],
                act="prelu").reshape(N, H, W, C)

    p2, (_, Ho2, Wo2) = conv3x3_patches(r, stride)
    bn2_s, bn2_b = p["bn2"]
    r = conv_mm(p2, p["conv2_w"], bn2_s, bn2_b,
                act="none").reshape(N, Ho2, Wo2, C)

    # --- SE module (tiled two-pass) + residual add ---
    HW = Ho2 * Wo2
    r_flat = r.reshape(N, HW, C)
    gate = se_gate(r_flat, p["se_w1"], p["se_w2"])
    out = se_apply(r_flat, sc.reshape(N, HW, C), gate)
    return out.reshape(N, Ho2, Wo2, C)


def arcface_forward(x_nchw, params):
    """Replicates ArcFace.forward: returns [input_layer(x), body[2], body[6], body[20], body[23]]."""
    x = jnp.transpose(x_nchw, (0, 2, 3, 1)).astype(jnp.bfloat16)          # NCHW -> NHWC, bf16
    out = input_layer_forward(x, params["input"])
    res = [out]
    for i, (bp, (_, _, stride)) in enumerate(zip(params["blocks"], _blocks_config_50())):
        out = block_forward(out, bp, stride=stride)
        if i in (2, 6, 20, 23):
            res.append(out)
    # back to NCHW, f32 (matching the PyTorch interface)
    return [jnp.transpose(r, (0, 3, 1, 2)).astype(jnp.float32) for r in res]


# ----------------------------------------------------------------------------
# Main
# ----------------------------------------------------------------------------

if __name__ == "__main__":
    key = jax.random.PRNGKey(0)
    kp, kx = jax.random.split(key)
    params = make_params(kp)

    # Small input consistent with the module: NCHW, 3 channels (IR-SE-50 takes RGB images).
    x = jax.random.normal(kx, (2, 3, 16, 16), jnp.float32)

    res = arcface_forward(x, params)
    res = jax.block_until_ready(res)

    expected = [(2, 64, 16, 16), (2, 64, 8, 8), (2, 128, 4, 4), (2, 256, 2, 2), (2, 512, 1, 1)]
    got = [tuple(int(d) for d in r.shape) for r in res]
    assert got == expected, f"shape mismatch: {got} vs {expected}"
    assert all(bool(jnp.all(jnp.isfinite(r))) for r in res), "non-finite output"

    print("KERNEL_OK")
</pallas_src>

<mosaic_0001>
module attributes {stable_mosaic.version = 11 : i64} {
  func.func @_conv_mm_kernel(%arg0: i32, %arg1: i32, %arg2: i32, %arg3: memref<1x256x27xbf16, #tpu.memory_space<vmem>>, %arg4: memref<1x27x64xbf16, #tpu.memory_space<vmem>>, %arg5: memref<1x64xf32, #tpu.memory_space<vmem>>, %arg6: memref<1x64xf32, #tpu.memory_space<vmem>>, %arg7: memref<1x64xf32, #tpu.memory_space<vmem>>, %arg8: memref<256x64xbf16, #tpu.memory_space<vmem>>, %arg9: memref<256x64xf32, #tpu.memory_space<vmem>>) attributes {dimension_semantics = [#tpu.dimension_semantics<parallel>, #tpu.dimension_semantics<parallel>, #tpu.dimension_semantics<arbitrary>], iteration_bounds = array<i64: 2, 1, 1>, scalar_prefetch = 0 : i64, scratch_operands = 1 : i64, tpu.core_type = #tpu.core_type<tc>, window_params = [{transform_indices = @transform_0, window_bounds = array<i64: 1, 256, 27>}, {transform_indices = @transform_1, window_bounds = array<i64: 1, 27, 64>}, {transform_indices = @transform_2, window_bounds = array<i64: 1, 64>}, {transform_indices = @transform_3, window_bounds = array<i64: 1, 64>}, {transform_indices = @transform_4, window_bounds = array<i64: 1, 64>}, {transform_indices = @transform_5, window_bounds = array<i64: 256, 64>}]} {
    %c0_i32 = arith.constant 0 : i32
    %0 = arith.cmpi eq, %arg2, %c0_i32 : i32
    %1 = arith.extui %0 : i1 to i32
    %c0_i32_0 = arith.constant 0 : i32
    %2 = arith.cmpi ne, %1, %c0_i32_0 : i32
    scf.if %2 {
      %cst_12 = arith.constant 0.000000e+00 : f32
      %14 = vector.broadcast %cst_12 : f32 to vector<256x64xf32>
      %c0_13 = arith.constant 0 : index
      %c0_14 = arith.constant 0 : index
      %15 = vector.load %arg9[%c0_13, %c0_14] : memref<256x64xf32, #tpu.memory_space<vmem>>, vector<256x64xf32>
      tpu.vector_store %arg9[%c0_13, %c0_14], %14 {strides = array<i32>} : memref<256x64xf32, #tpu.memory_space<vmem>>, vector<256x64xf32>,
    } else {
    }
    %c0 = arith.constant 0 : index
    %c0_1 = arith.constant 0 : index
    %3 = vector.load %arg9[%c0, %c0_1] : memref<256x64xf32, #tpu.memory_space<vmem>>, vector<256x64xf32>
    %c0_2 = arith.constant 0 : index
    %c0_3 = arith.constant 0 : index
    %c0_4 = arith.constant 0 : index
    %4 = vector.load %arg3[%c0_2, %c0_3, %c0_4] : memref<1x256x27xbf16, #tpu.memory_space<vmem>>, vector<1x256x27xbf16>
    %5 = vector.shape_cast %4 : vector<1x256x27xbf16> to vector<256x27xbf16>
    %c0_5 = arith.constant 0 : index
    %c0_6 = arith.constant 0 : index
    %c0_7 = arith.constant 0 : index
    %6 = vector.load %arg4[%c0_5, %c0_6, %c0_7] : memref<1x27x64xbf16, #tpu.memory_space<vmem>>, vector<1x27x64xbf16>
    %7 = vector.shape_cast %6 : vector<1x27x64xbf16> to vector<27x64xbf16>
    %cst = arith.constant dense<0.000000e+00> : vector<256x64xf32>
    %8 = tpu.matmul %5, %7, %cst {dimension_numbers = #tpu.dot_dimension_numbers<[1], [0], [0], [1], [0, 0, 1, 1], [], []>} : vector<256x27xbf16>, vector<27x64xbf16>, vector<256x64xf32> -> vector<256x64xf32>
    %9 = arith.addf %3, %8 : vector<256x64xf32>
    %c0_8 = arith.constant 0 : index
    %c0_9 = arith.constant 0 : index
    %10 = vector.load %arg9[%c0_8, %c0_9] : memref<256x64xf32, #tpu.memory_space<vmem>>, vector<256x64xf32>
    tpu.vector_store %arg9[%c0_8, %c0_9], %9 {strides = array<i32>} : memref<256x64xf32, #tpu.memory_space<vmem>>, vector<256x64xf32>,
    %c0_i32_10 = arith.constant 0 : i32
    %11 = arith.cmpi eq, %arg2, %c0_i32_10 : i32
    %12 = arith.extui %11 : i1 to i32
    %c0_i32_11 = arith.constant 0 : i32
    %13 = arith.cmpi ne, %12, %c0_i32_11 : i32
    scf.if %13 {
      %c0_12 = arith.constant 0 : index
      %c0_13 = arith.constant 0 : index
      %14 = vector.load %arg9[%c0_12, %c0_13] : memref<256x64xf32, #tpu.memory_space<vmem>>, vector<256x64xf32>
      %c0_14 = arith.constant 0 : index
      %c0_15 = arith.constant 0 : index
      %15 = vector.load %arg5[%c0_14, %c0_15] : memref<1x64xf32, #tpu.memory_space<vmem>>, vector<1x64xf32>
      %16 = vector.broadcast %15 : vector<1x64xf32> to vector<256x64xf32>
      %17 = arith.mulf %14, %16 : vector<256x64xf32>
      %c0_16 = arith.constant 0 : index
      %c0_17 = arith.constant 0 : index
      %18 = vector.load %arg6[%c0_16, %c0_17] : memref<1x64xf32, #tpu.memory_space<vmem>>, vector<1x64xf32>
      %19 = vector.broadcast %18 : vector<1x64xf32> to vector<256x64xf32>
      %20 = arith.addf %17, %19 : vector<256x64xf32>
      %cst_18 = arith.constant 0.000000e+00 : f32
      %21 = vector.broadcast %cst_18 : f32 to vector<256x64xf32>
      %22 = arith.cmpf oge, %20, %21 : vector<256x64xf32>
      %c0_19 = arith.constant 0 : index
      %c0_20 = arith.constant 0 : index
      %23 = vector.load %arg7[%c0_19, %c0_20] : memref<1x64xf32, #tpu.memory_space<vmem>>, vector<1x64xf32>
      %24 = vector.broadcast %23 : vector<1x64xf32> to vector<256x64xf32>
      %25 = arith.mulf %20, %24 : vector<256x64xf32>
      %26 = arith.select %22, %20, %25 : vector<256x64xi1>, vector<256x64xf32>
      %27 = arith.truncf %26 : vector<256x64xf32> to vector<256x64xbf16>
      %c0_21 = arith.constant 0 : index
      %c0_22 = arith.constant 0 : index
      %28 = vector.load %arg8[%c0_21, %c0_22] : memref<256x64xbf16, #tpu.memory_space<vmem>>, vector<256x64xbf16>
      tpu.vector_store %arg8[%c0_21, %c0_22], %27 {strides = array<i32>} : memref<256x64xbf16, #tpu.memory_space<vmem>>, vector<256x64xbf16>,
    } else {
    }
    return
  }
  func.func @transform_0(%arg0: i32, %arg1: i32, %arg2: i32) -> (i32, i32, i32) {
    %c0_i32 = arith.constant 0 : i32
    %c0_i32_0 = arith.constant 0 : i32
    return %arg2, %arg0, %c0_i32 : i32, i32, i32
  }
  func.func @transform_1(%arg0: i32, %arg1: i32, %arg2: i32) -> (i32, i32, i32) {
    %c0_i32 = arith.constant 0 : i32
    %c0_i32_0 = arith.constant 0 : i32
    return %arg2, %c0_i32, %arg1 : i32, i32, i32
  }
  func.func @transform_2(%arg0: i32, %arg1: i32, %arg2: i32) -> (i32, i32) {
    %c0_i32 = arith.constant 0 : i32
    %c0_i32_0 = arith.constant 0 : i32
    return %c0_i32, %arg1 : i32, i32
  }
  func.func @transform_3(%arg0: i32, %arg1: i32, %arg2: i32) -> (i32, i32) {
    %c0_i32 = arith.constant 0 : i32
    %c0_i32_0 = arith.constant 0 : i32
    return %c0_i32, %arg1 : i32, i32
  }
  func.func @transform_4(%arg0: i32, %arg1: i32, %arg2: i32) -> (i32, i32) {
    %c0_i32 = arith.constant 0 : i32
    %c0_i32_0 = arith.constant 0 : i32
    return %c0_i32, %arg1 : i32, i32
  }
  func.func @transform_5(%arg0: i32, %arg1: i32, %arg2: i32) -> (i32, i32) {
    %c0_i32 = arith.constant 0 : i32
    return %arg0, %arg1 : i32, i32
  }
}

</mosaic_0001>

<bundles_post_ra>
// kernel: conv_mm.1
= control target key start
LH: loop header
LB: loop body
LE: loop exit
PB: predicated region body
PF: predicated region fallthrough
CT: control target
= control target key end

     0   :  { %s1374_s18 = smov 0   ;;  %s1376_s19 = smov 0   ;;  %s1698_s0 = inlined_call_operand.vmem [shape: bf16[1,512,27], index: 0, kind: input, shape index: {}]   ;;  %s1699_s1 = inlined_call_operand.vmem [shape: bf16[1,27,64], index: 1, kind: input, shape index: {}]   ;;  %s1700_s2 = inlined_call_operand.vmem [shape: f32[1,64], index: 2, kind: input, shape index: {}]   ;;  %s1701_s3 = inlined_call_operand.vmem [shape: f32[1,64], index: 3, kind: input, shape index: {}]   ;;  %s1702_s4 = inlined_call_operand.vmem [shape: f32[1,64], index: 4, kind: input, shape index: {}]   ;;  %s1703_s5 = inlined_call_operand.vmem [shape: bf16[512,64], index: 5, kind: output, shape index: {}]  }
   0x1   :  { %s1378_s20 = smov 0  }
   0x2 LB: > { %s34_s21 = sadd.s32 1, %s1336_s19  ;;  %p1170_p0 = scmp.ge.s32.totalorder %s1340_s20, 1  ;;  %s1340_s20 = sphi %s1378_s20, %s15_s20   ;;  %s1336_s19 = sphi %s1376_s19, %s1705_s19   ;;  %s1332_s18 = sphi %s1374_s18, %s1704_s18  }
   0x3   : > { %p36_p1 = scmp.ge.s32.totalorder %s34_s21, 2  ;;  %p254_p2 = scmp.lt.s32.totalorder %s1340_s20, 3 }
   0x5   : > { %s1707_s21 = smov (%p36_p1, %s34_s21), 0  ;;  %p255_p3 = pnand %p1170_p0, %p254_p2 }
   0x6   : > { %s1171_s26 = sshll.u32 (!%p255_p3), %s1332_s18, 5 }
   0x7   : > { %258 = sbr.rel (%p255_p3) target bundleno = 237 (0xed), region = 40  ;;  %p309_p4 = scmp.lt.s32.totalorder (!%p255_p3), %s1171_s26, 63 }
   0xc   : > { %v1245_v0 = vld [vmem:[%s1699_s1 + $0x8] sm:$0xf]  ;;  %v1282_v1 = vld [vmem:[%s1699_s1 + $0x8] sm:$0x30]  ;;  %vm588_vm0 = vcmask 1044480   ;;  %vm589_vm1 = vcmask 1045504  }
   0xd   : > { %v1246_v2 = vor.u32 %v1282_v1, %v1245_v0  ;;  %v1342_v3 = vmov 65535   ;;  %s1709_s26 = smov (!%p309_p4, %s1171_s26), 63  ;;  %v1281_v7 = vld [vmem:[%s1699_s1] sm:$0xff]  ;;  %vm539_vm2 = vcmask 220160   ;;  %vm347_vm3 = vcmask 523264  }
   0xe   : > { %v590_v4 = vsel %vm588_vm0, 4294967295, %v1342_v3  ;;  %s1172_s29 = sshll.u32 %s1709_s26, 2  ;;  %v1343_v16 = vmov 0.0   ;;  %v1480_v35 = vld [vmem:[%s1700_s2] ss:$0 sm:$0xff]  ;;  %vm988_vm6 = vcmask 519168  }
   0xf   : > { %v591_v5 = vsel %vm589_vm1, %v590_v4, 0  ;;  %s1409_s7 = scalar_lea.vmem %s1698_s0, %s1172_s29  ;;  %348 = vst.msk [vmem:[#allocation2] sm:$0xff] %vm347_vm3, %v1343_v16  ;;  %v1485_v42 = vld [vmem:[%s1701_s3] ss:$0 sm:$0xff]  ;;  %s1507_s16 = scalar_lea.vmem %s1703_s5, %s1172_s29 }
  0x10   : > { %v593_v6 = vand.u32 %v1246_v2, %v591_v5  ;;  %v1265_v8 = vld [vmem:[%s1409_s7] sm:$0xff]  ;;  %v1266_v12 = vld [vmem:[%s1409_s7 + $0x8] sm:$0xff]  ;;  %349 = vst.msk [vmem:[#allocation2 + $0x8] sm:$0xff] %vm347_vm3, %v1343_v16  ;;  %v1267_v17 = vld [vmem:[%s1409_s7 + $0x10] sm:$0xff] }
  0x11   : > { %v1269_v9 = vld [vmem:[%s1409_s7 + $0x20] sm:$0xff]  ;;  %v1270_v13 = vld [vmem:[%s1409_s7 + $0x28] sm:$0xff]  ;;  %350 = vst.msk [vmem:[#allocation2 + $0x10] sm:$0xff] %vm347_vm3, %v1343_v16  ;;  %v1271_v18 = vld [vmem:[%s1409_s7 + $0x30] sm:$0xff] }
  0x12   : > { %601 = vmatpush.bf16.msra.mxu0 %v593_v6  ;;  %1283 = vmatpush.bf16.msra.mxu1 %v593_v6  ;;  %v1273_v10 = vld [vmem:[%s1409_s7 + $0x40] sm:$0xff]  ;;  %v1274_v14 = vld [vmem:[%s1409_s7 + $0x48] sm:$0xff]  ;;  %351 = vst.msk [vmem:[#allocation2 + $0x18] sm:$0xff] %vm347_vm3, %v1343_v16  ;;  %v1275_v19 = vld [vmem:[%s1409_s7 + $0x50] sm:$0xff] }
  0x13   : > { %1284 = vmatpush.bf16.msra.mxu2 %v593_v6  ;;  %1285 = vmatpush.bf16.msra.mxu3 %v593_v6  ;;  %v1277_v11 = vld [vmem:[%s1409_s7 + $0x60] sm:$0xff]  ;;  %v1278_v15 = vld [vmem:[%s1409_s7 + $0x68] sm:$0xff]  ;;  %352 = vst.msk [vmem:[#allocation2 + $0x20] sm:$0xff] %vm347_vm3, %v1343_v16  ;;  %v1279_v20 = vld [vmem:[%s1409_s7 + $0x70] sm:$0xff] }
  0x14   : > { %353 = vst.msk [vmem:[#allocation2 + $0x28] sm:$0xff] %vm347_vm3, %v1343_v16  ;;  %v1268_v21 = vld [vmem:[%s1409_s7 + $0x18] sm:$0xff]  ;;  %v1492_v47 = vld [vmem:[%s1702_s4] ss:$0 sm:$0xff] }
  0x15   : > { %354 = vst.msk [vmem:[#allocation2 + $0x30] sm:$0xff] %vm347_vm3, %v1343_v16  ;;  %v1272_v22 = vld [vmem:[%s1409_s7 + $0x38] sm:$0xff] }
  0x16   : > { %602 = vmatpush.bf16.msra.mxu0 %v1281_v7  ;;  %1286 = vmatpush.bf16.msra.mxu1 %v1281_v7  ;;  %355 = vst.msk [vmem:[#allocation2 + $0x38] sm:$0xff] %vm347_vm3, %v1343_v16  ;;  %v1276_v23 = vld [vmem:[%s1409_s7 + $0x58] sm:$0xff]  ;;  %v380_v25 = vld [vmem:[#allocation2] sm:$0xff] }
  0x17   : > { %1287 = vmatpush.bf16.msra.mxu2 %v1281_v7  ;;  %1288 = vmatpush.bf16.msra.mxu3 %v1281_v7  ;;  %356 = vst.msk [vmem:[#allocation2 + $0x40] sm:$0xff] %vm347_vm3, %v1343_v16  ;;  %v1280_v24 = vld [vmem:[%s1409_s7 + $0x78] sm:$0xff]  ;;  %v381_v33 = vld [vmem:[#allocation2 + $0x8] sm:$0xff] }
  0x18   : > { %357 = vst.msk [vmem:[#allocation2 + $0x48] sm:$0xff] %vm347_vm3, %v1343_v16  ;;  %v382_v57 = vld [vmem:[#allocation2 + $0x10] sm:$0xff] }
  0x19   : > { %1247 = vmatmul.msk.bf16.vlgmr.msra.gmra.mxu0 %vm539_vm2, %v1265_v8  ;;  %1251 = vmatmul.msk.bf16.vlgmr.msra.gmra.mxu1 %vm539_vm2, %v1269_v9  ;;  %358 = vst.msk [vmem:[#allocation2 + $0x50] sm:$0xff] %vm347_vm3, %v1343_v16 }
  0x1a   : > { %1255 = vmatmul.msk.bf16.vlgmr.msra.gmra.mxu2 %vm539_vm2, %v1273_v10  ;;  %1259 = vmatmul.msk.bf16.vlgmr.msra.gmra.mxu3 %vm539_vm2, %v1277_v11  ;;  %359 = vst.msk [vmem:[#allocation2 + $0x58] sm:$0xff] %vm347_vm3, %v1343_v16 }
  0x1b   : > { %360 = vst.msk [vmem:[#allocation2 + $0x60] sm:$0xff] %vm347_vm3, %v1343_v16 }
  0x1c   : > { %361 = vst.msk [vmem:[#allocation2 + $0x68] sm:$0xff] %vm347_vm3, %v1343_v16 }
  0x1d   : > { %362 = vst.msk [vmem:[#allocation2 + $0x70] sm:$0xff] %vm347_vm3, %v1343_v16 }
  0x1e   : > { %363 = vst.msk [vmem:[#allocation2 + $0x78] sm:$0xff] %vm347_vm3, %v1343_v16  ;;  %v388_v26 = vld [vmem:[#allocation2 + $0x40] sm:$0xff] }
  0x1f   : > { %364 = vst.msk [vmem:[#allocation2 + $0x80] sm:$0xff] %vm347_vm3, %v1343_v16  ;;  %v389_v34 = vld [vmem:[#allocation2 + $0x48] sm:$0xff] }
  0x20   : > { %365 = vst.msk [vmem:[#allocation2 + $0x88] sm:$0xff] %vm347_vm3, %v1343_v16  ;;  %v390_v62 = vld [vmem:[#allocation2 + $0x50] sm:$0xff] }
  0x21   : > { %366 = vst.msk [vmem:[#allocation2 + $0x90] sm:$0xff] %vm347_vm3, %v1343_v16 }
  0x22   : > { %367 = vst.msk [vmem:[#allocation2 + $0x98] sm:$0xff] %vm347_vm3, %v1343_v16 }
  0x23   : > { %368 = vst.msk [vmem:[#allocation2 + $0xa0] sm:$0xff] %vm347_vm3, %v1343_v16 }
  0x24   : > { %369 = vst.msk [vmem:[#allocation2 + $0xa8] sm:$0xff] %vm347_vm3, %v1343_v16 }
  0x25   : > { %370 = vst.msk [vmem:[#allocation2 + $0xb0] sm:$0xff] %vm347_vm3, %v1343_v16 }
  0x26   : > { %371 = vst.msk [vmem:[#allocation2 + $0xb8] sm:$0xff] %vm347_vm3, %v1343_v16  ;;  %v396_v31 = vld [vmem:[#allocation2 + $0x80] sm:$0xff] }
  0x27   : > { %372 = vst.msk [vmem:[#allocation2 + $0xc0] sm:$0xff] %vm347_vm3, %v1343_v16  ;;  %v397_v51 = vld [vmem:[#allocation2 + $0x88] sm:$0xff] }
  0x28   : > { %373 = vst.msk [vmem:[#allocation2 + $0xc8] sm:$0xff] %vm347_vm3, %v1343_v16 }
  0x29   : > { %1248 = vmatmul.msk.bf16.gmra.mxu0 %vm539_vm2, %v1266_v12  ;;  %1252 = vmatmul.msk.bf16.gmra.mxu1 %vm539_vm2, %v1270_v13  ;;  %374 = vst.msk [vmem:[#allocation2 + $0xd0] sm:$0xff] %vm347_vm3, %v1343_v16 }
  0x2a   : > { %1256 = vmatmul.msk.bf16.gmra.mxu2 %vm539_vm2, %v1274_v14  ;;  %1260 = vmatmul.msk.bf16.gmra.mxu3 %vm539_vm2, %v1278_v15  ;;  %375 = vst.msk [vmem:[#allocation2 + $0xd8] sm:$0xff] %vm347_vm3, %v1343_v16 }
  0x2b   : > { %376 = vst.msk [vmem:[#allocation2 + $0xe0] sm:$0xff] %vm347_vm3, %v1343_v16 }
  0x2c   : > { %377 = vst.msk [vmem:[#allocation2 + $0xe8] sm:$0xff] %vm347_vm3, %v1343_v16 }
  0x2d   : > { %378 = vst.msk [vmem:[#allocation2 + $0xf0] sm:$0xff] %vm347_vm3, %v1343_v16 }
  0x2e   : > { %379 = vst.msk [vmem:[#allocation2 + $0xf8] sm:$0xff] %vm347_vm3, %v1343_v16  ;;  %v404_v32 = vld [vmem:[#allocation2 + $0xc0] sm:$0xff]  ;;  %v398_v16 = vld [vmem:[#allocation2 + $0x90] sm:$0xff] }
  0x2f   : > { %v405_v52 = vld [vmem:[#allocation2 + $0xc8] sm:$0xff] }
  0x39   : > { %1249 = vmatmul.msk.bf16.gmra.mxu0 %vm539_vm2, %v1267_v17  ;;  %1253 = vmatmul.msk.bf16.gmra.mxu1 %vm539_vm2, %v1271_v18 }
  0x3a   : > { %1257 = vmatmul.msk.bf16.gmra.mxu2 %vm539_vm2, %v1275_v19  ;;  %1261 = vmatmul.msk.bf16.gmra.mxu3 %vm539_vm2, %v1279_v20 }
  0x49   : > { %1250 = vmatmul.msk.bf16.gmra.mxu0 %vm539_vm2, %v1268_v21  ;;  %1254 = vmatmul.msk.bf16.gmra.mxu1 %vm539_vm2, %v1272_v22 }
  0x4a   : > { %1258 = vmatmul.msk.bf16.gmra.mxu2 %vm539_vm2, %v1276_v23  ;;  %1262 = vmatmul.msk.bf16.gmra.mxu3 %vm539_vm2, %v1280_v24 }
  0x96   : > { %v604_v27 = vpop.f32.mrf.mxu0  ;;  %v624_v28 = vpop.f32.mrf.mxu1 }
  0x97   : > { %v684_v29 = vadd.f32 %v604_v27, %v380_v25  ;;  %v692_v30 = vadd.f32 %v624_v28, %v388_v26  ;;  %v406_v26 = vld [vmem:[#allocation2 + $0xd0] sm:$0xff] }
  0x99   : > { %717 = vst.msk [vmem:[#allocation2] sm:$0xff] %vm347_vm3, %v684_v29 }
  0x9a   : > { %725 = vst.msk [vmem:[#allocation2 + $0x40] sm:$0xff] %vm347_vm3, %v692_v30 }
  0x9d   : > { %v644_v36 = vpop.f32.mrf.mxu2  ;;  %v664_v37 = vpop.f32.mrf.mxu3 }
  0x9e   : > { %v700_v38 = vadd.f32 %v644_v36, %v396_v31  ;;  %v708_v39 = vadd.f32 %v664_v37, %v404_v32  ;;  %v606_v40 = vpop.f32.mrf.mxu0  ;;  %v626_v41 = vpop.f32.mrf.mxu1 }
  0x9f   : > { %v685_v43 = vadd.f32 %v606_v40, %v381_v33  ;;  %v693_v44 = vadd.f32 %v626_v41, %v389_v34  ;;  %v383_v33 = vld [vmem:[#allocation2 + $0x18] sm:$0xff] }
  0xa0   : > { %v752_v45 = vld [vmem:[#allocation2] sm:$0xff]  ;;  %733 = vst.msk [vmem:[#allocation2 + $0x80] sm:$0xff] %vm347_vm3, %v700_v38 }
  0xa1   : > { %v788_v46 = vmul.f32 %v1480_v35, %v752_v45  ;;  %v760_v48 = vld [vmem:[#allocation2 + $0x40] sm:$0xff]  ;;  %741 = vst.msk [vmem:[#allocation2 + $0xc0] sm:$0xff] %vm347_vm3, %v708_v39  ;;  %v391_v39 = vld [vmem:[#allocation2 + $0x58] sm:$0xff] }
  0xa2   : > { %v796_v49 = vmul.f32 %v1480_v35, %v760_v48  ;;  %718 = vst.msk [vmem:[#allocation2 + $0x8] sm:$0xff] %vm347_vm3, %v685_v43 }
  0xa3   : > { %v824_v50 = vadd.f32 %v1485_v42, %v788_v46  ;;  %726 = vst.msk [vmem:[#allocation2 + $0x48] sm:$0xff] %vm347_vm3, %v693_v44 }
  0xa4   : > { %v832_v53 = vadd.f32 %v1485_v42, %v796_v49 }
  0xa5   : > { %vm856_vm4 = vcmp.ge.f32.partialorder %v824_v50, 0.0  ;;  %v892_v54 = vmul.f32 %v1492_v47, %v824_v50  ;;  %v646_v55 = vpop.f32.mrf.mxu2  ;;  %v666_v56 = vpop.f32.mrf.mxu3 }
  0xa6   : > { %vm864_vm5 = vcmp.ge.f32.partialorder %v832_v53, 0.0  ;;  %v900_v58 = vmul.f32 %v1492_v47, %v832_v53  ;;  %v701_v59 = vadd.f32 %v646_v55, %v397_v51  ;;  %v709_v60 = vadd.f32 %v666_v56, %v405_v52  ;;  %v609_v61 = vpop.f32.mrf.mxu0  ;;  %v629_v63 = vpop.f32.mrf.mxu1  ;;  %v399_v52 = vld [vmem:[#allocation2 + $0x98] sm:$0xff] }
  0xa7   : > { %v924_v0 = vsel %vm856_vm4, %v824_v50, %v892_v54  ;;  %v768_v1 = vld [vmem:[#allocation2 + $0x80] sm:$0xff]  ;;  %v686_v6 = vadd.f32 %v609_v61, %v382_v57  ;;  %v694_v10 = vadd.f32 %v629_v63, %v390_v62 }
  0xa8   : > { %v956_v2 = vpack.c.bf16 %v924_v0, %v924_v0  ;;  %v932_v3 = vsel %vm864_vm5, %v832_v53, %v900_v58  ;;  %v804_v4 = vmul.f32 %v1480_v35, %v768_v1  ;;  %v776_v5 = vld [vmem:[#allocation2 + $0xc0] sm:$0xff]  ;;  %734 = vst.msk [vmem:[#allocation2 + $0x88] sm:$0xff] %vm347_vm3, %v701_v59  ;;  %v407_v53 = vld [vmem:[#allocation2 + $0xd8] sm:$0xff] }
  0xa9   : > { %v964_v7 = vpack.c.bf16 %v932_v3, %v932_v3  ;;  %v812_v8 = vmul.f32 %v1480_v35, %v776_v5  ;;  %v753_v9 = vld [vmem:[#allocation2 + $0x8] sm:$0xff]  ;;  %742 = vst.msk [vmem:[#allocation2 + $0xc8] sm:$0xff] %vm347_vm3, %v709_v60  ;;  %v384_v57 = vld [vmem:[#allocation2 + $0x20] sm:$0xff] }
  0xaa   : > { %989 = vst.msk [vmem:[%s1507_s16] sm:$0xf] %vm988_vm6, %v956_v2  ;;  %v840_v11 = vadd.f32 %v1485_v42, %v804_v4  ;;  %v789_v12 = vmul.f32 %v1480_v35, %v753_v9  ;;  %v761_v13 = vld [vmem:[#allocation2 + $0x48] sm:$0xff] }
  0xab   : > { %997 = vst.msk [vmem:[%s1507_s16 + $0x20] sm:$0xf] %vm988_vm6, %v964_v7  ;;  %v848_v14 = vadd.f32 %v1485_v42, %v812_v8  ;;  %v797_v15 = vmul.f32 %v1480_v35, %v761_v13 }
  0xac   : > { %vm872_vm7 = vcmp.ge.f32.partialorder %v840_v11, 0.0  ;;  %v908_v17 = vmul.f32 %v1492_v47, %v840_v11  ;;  %v825_v18 = vadd.f32 %v1485_v42, %v789_v12  ;;  %719 = vst.msk [vmem:[#allocation2 + $0x10] sm:$0xff] %vm347_vm3, %v686_v6  ;;  %v392_v12 = vld [vmem:[#allocation2 + $0x60] sm:$0xff] }
  0xad   : > { %vm880_vm8 = vcmp.ge.f32.partialorder %v848_v14, 0.0  ;;  %v916_v19 = vmul.f32 %v1492_v47, %v848_v14  ;;  %v833_v20 = vadd.f32 %v1485_v42, %v797_v15  ;;  %727 = vst.msk [vmem:[#allocation2 + $0x50] sm:$0xff] %vm347_vm3, %v694_v10  ;;  %v649_v21 = vpop.f32.mrf.mxu2  ;;  %v669_v22 = vpop.f32.mrf.mxu3 }
  0xae   : > { %v940_v23 = vsel %vm872_vm7, %v840_v11, %v908_v17  ;;  %vm857_vm9 = vcmp.ge.f32.partialorder %v825_v18, 0.0  ;;  %v893_v24 = vmul.f32 %v1492_v47, %v825_v18  ;;  %v702_v25 = vadd.f32 %v649_v21, %v398_v16  ;;  %v611_v27 = vpop.f32.mrf.mxu0  ;;  %v631_v28 = vpop.f32.mrf.mxu1 }
  0xaf   : > { %v972_v29 = vpack.c.bf16 %v940_v23, %v940_v23  ;;  %v948_v30 = vsel %vm880_vm8, %v848_v14, %v916_v19  ;;  %vm865_vm10 = vcmp.ge.f32.partialorder %v833_v20, 0.0  ;;  %v901_v31 = vmul.f32 %v1492_v47, %v833_v20  ;;  %v769_v32 = vld [vmem:[#allocation2 + $0x88] sm:$0xff]  ;;  %v400_v19 = vld [vmem:[#allocation2 + $0xa0] sm:$0xff] }
  0xb0   : > { %v980_v34 = vpack.c.bf16 %v948_v30, %v948_v30  ;;  %v925_v36 = vsel %vm857_vm9, %v825_v18, %v893_v24  ;;  %v805_v37 = vmul.f32 %v1480_v35, %v769_v32  ;;  %v777_v38 = vld [vmem:[#allocation2 + $0xc8] sm:$0xff]  ;;  %735 = vst.msk [vmem:[#allocation2 + $0x90] sm:$0xff] %vm347_vm3, %v702_v25  ;;  %v710_v44 = vadd.f32 %v669_v22, %v406_v26 }
  0xb1   : > { %1005 = vst.msk [vmem:[%s1507_s16 + $0x40] sm:$0xf] %vm988_vm6, %v972_v29  ;;  %v957_v40 = vpack.c.bf16 %v925_v36, %v925_v36  ;;  %v933_v41 = vsel %vm865_vm10, %v833_v20, %v901_v31  ;;  %v813_v43 = vmul.f32 %v1480_v35, %v777_v38  ;;  %v687_v48 = vadd.f32 %v611_v27, %v383_v33  ;;  %v408_v20 = vld [vmem:[#allocation2 + $0xe0] sm:$0xff]  ;;  %v385_v24 = vld [vmem:[#allocation2 + $0x28] sm:$0xff] }
  0xb2   : > { %1013 = vst.msk [vmem:[%s1507_s16 + $0x60] sm:$0xf] %vm988_vm6, %v980_v34  ;;  %v965_v45 = vpack.c.bf16 %v933_v41, %v933_v41  ;;  %v841_v46 = vadd.f32 %v1485_v42, %v805_v37  ;;  %v695_v51 = vadd.f32 %v631_v28, %v391_v39  ;;  %v393_v29 = vld [vmem:[#allocation2 + $0x68] sm:$0xff] }
  0xb3   : > { %990 = vst.msk [vmem:[%s1507_s16 + $0x4] sm:$0xf] %vm988_vm6, %v957_v40  ;;  %v849_v49 = vadd.f32 %v1485_v42, %v813_v43  ;;  %v754_v50 = vld [vmem:[#allocation2 + $0x10] sm:$0xff] }
  0xb4   : > { %998 = vst.msk [vmem:[%s1507_s16 + $0x24] sm:$0xf] %vm988_vm6, %v965_v45  ;;  %vm873_vm11 = vcmp.ge.f32.partialorder %v841_v46, 0.0  ;;  %v909_v54 = vmul.f32 %v1492_v47, %v841_v46  ;;  %v790_v55 = vmul.f32 %v1480_v35, %v754_v50  ;;  %v762_v56 = vld [vmem:[#allocation2 + $0x50] sm:$0xff] }
  0xb5   : > { %vm881_vm12 = vcmp.ge.f32.partialorder %v849_v49, 0.0  ;;  %v917_v58 = vmul.f32 %v1492_v47, %v849_v49  ;;  %v798_v59 = vmul.f32 %v1480_v35, %v762_v56  ;;  %743 = vst.msk [vmem:[#allocation2 + $0xd0] sm:$0xff] %vm347_vm3, %v710_v44  ;;  %v651_v60 = vpop.f32.mrf.mxu2  ;;  %v671_v61 = vpop.f32.mrf.mxu3 }
  0xb6   : > { %v941_v62 = vsel %vm873_vm11, %v841_v46, %v909_v54  ;;  %v826_v63 = vadd.f32 %v1485_v42, %v790_v55  ;;  %720 = vst.msk [vmem:[#allocation2 + $0x18] sm:$0xff] %vm347_vm3, %v687_v48  ;;  %v703_v0 = vadd.f32 %v651_v60, %v399_v52  ;;  %v711_v1 = vadd.f32 %v671_v61, %v407_v53  ;;  %v614_v2 = vpop.f32.mrf.mxu0  ;;  %v634_v3 = vpop.f32.mrf.mxu1 }
  0xb7   : > { %v973_v4 = vpack.c.bf16 %v941_v62, %v941_v62  ;;  %v949_v5 = vsel %vm881_vm12, %v849_v49, %v917_v58  ;;  %v834_v6 = vadd.f32 %v1485_v42, %v798_v59  ;;  %v770_v7 = vld [vmem:[#allocation2 + $0x90] sm:$0xff]  ;;  %728 = vst.msk [vmem:[#allocation2 + $0x58] sm:$0xff] %vm347_vm3, %v695_v51  ;;  %v688_v8 = vadd.f32 %v614_v2, %v384_v57  ;;  %v401_v57 = vld [vmem:[#allocation2 + $0xa8] sm:$0xff] }
  0xb8   : > { %v981_v9 = vpack.c.bf16 %v949_v5, %v949_v5  ;;  %vm858_vm13 = vcmp.ge.f32.partialorder %v826_v63, 0.0  ;;  %v894_v10 = vmul.f32 %v1492_v47, %v826_v63  ;;  %v806_v11 = vmul.f32 %v1480_v35, %v770_v7  ;;  %736 = vst.msk [vmem:[#allocation2 + $0x98] sm:$0xff] %vm347_vm3, %v703_v0  ;;  %v409_v58 = vld [vmem:[#allocation2 + $0xe8] sm:$0xff] }
  0xb9   : > { %1006 = vst.msk [vmem:[%s1507_s16 + $0x44] sm:$0xf] %vm988_vm6, %v973_v4  ;;  %vm866_vm14 = vcmp.ge.f32.partialorder %v834_v6, 0.0  ;;  %v902_v13 = vmul.f32 %v1492_v47, %v834_v6  ;;  %v696_v18 = vadd.f32 %v634_v3, %v392_v12 }
  0xba   : > { %1014 = vst.msk [vmem:[%s1507_s16 + $0x64] sm:$0xf] %vm988_vm6, %v981_v9  ;;  %v926_v14 = vsel %vm858_vm13, %v826_v63, %v894_v10  ;;  %v842_v15 = vadd.f32 %v1485_v42, %v806_v11  ;;  %v386_v9 = vld [vmem:[#allocation2 + $0x30] sm:$0xff] }
  0xbb   : > { %v958_v16 = vpack.c.bf16 %v926_v14, %v926_v14  ;;  %v934_v17 = vsel %vm866_vm14, %v834_v6, %v902_v13  ;;  %744 = vst.msk [vmem:[#allocation2 + $0xd8] sm:$0xff] %vm347_vm3, %v711_v1 }
  0xbc   : > { %v966_v21 = vpack.c.bf16 %v934_v17, %v934_v17  ;;  %vm874_vm15 = vcmp.ge.f32.partialorder %v842_v15, 0.0  ;;  %v910_v22 = vmul.f32 %v1492_v47, %v842_v15  ;;  %v778_v23 = vld [vmem:[#allocation2 + $0xd0] sm:$0xff]  ;;  %721 = vst.msk [vmem:[#allocation2 + $0x20] sm:$0xff] %vm347_vm3, %v688_v8 }
  0xbd   : > { %991 = vst.msk [vmem:[%s1507_s16 + $0x8] sm:$0xf] %vm988_vm6, %v958_v16  ;;  %v814_v25 = vmul.f32 %v1480_v35, %v778_v23  ;;  %v755_v26 = vld [vmem:[#allocation2 + $0x18] sm:$0xff]  ;;  %v654_v27 = vpop.f32.mrf.mxu2  ;;  %v674_v28 = vpop.f32.mrf.mxu3 }
  0xbe   : > { %999 = vst.msk [vmem:[%s1507_s16 + $0x28] sm:$0xf] %vm988_vm6, %v966_v21  ;;  %v942_v30 = vsel %vm874_vm15, %v842_v15, %v910_v22  ;;  %v791_v31 = vmul.f32 %v1480_v35, %v755_v26  ;;  %v763_v32 = vld [vmem:[#allocation2 + $0x58] sm:$0xff]  ;;  %v704_v33 = vadd.f32 %v654_v27, %v400_v19  ;;  %v712_v34 = vadd.f32 %v674_v28, %v408_v20  ;;  %v616_v36 = vpop.f32.mrf.mxu0  ;;  %v636_v37 = vpop.f32.mrf.mxu1 }
  0xbf   : > { %v974_v38 = vpack.c.bf16 %v942_v30, %v942_v30  ;;  %v850_v39 = vadd.f32 %v1485_v42, %v814_v25  ;;  %v799_v40 = vmul.f32 %v1480_v35, %v763_v32  ;;  %v771_v41 = vld [vmem:[#allocation2 + $0x98] sm:$0xff]  ;;  %729 = vst.msk [vmem:[#allocation2 + $0x60] sm:$0xff] %vm347_vm3, %v696_v18  ;;  %v689_v43 = vadd.f32 %v616_v36, %v385_v24  ;;  %v394_v18 = vld [vmem:[#allocation2 + $0x70] sm:$0xff] }
  0xc0   : > { %v827_v44 = vadd.f32 %v1485_v42, %v791_v31  ;;  %v807_v45 = vmul.f32 %v1480_v35, %v771_v41  ;;  %737 = vst.msk [vmem:[#allocation2 + $0xa0] sm:$0xff] %vm347_vm3, %v704_v33  ;;  %v697_v46 = vadd.f32 %v636_v37, %v393_v29  ;;  %v402_v32 = vld [vmem:[#allocation2 + $0xb0] sm:$0xff] }
  0xc1   : > { %1007 = vst.msk [vmem:[%s1507_s16 + $0x48] sm:$0xf] %vm988_vm6, %v974_v38  ;;  %vm882_vm0 = vcmp.ge.f32.partialorder %v850_v39, 0.0  ;;  %v918_v48 = vmul.f32 %v1492_v47, %v850_v39  ;;  %v835_v49 = vadd.f32 %v1485_v42, %v799_v40  ;;  %v410_v33 = vld [vmem:[#allocation2 + $0xf0] sm:$0xff] }
  0xc2   : > { %vm859_vm1 = vcmp.ge.f32.partialorder %v827_v44, 0.0  ;;  %v895_v50 = vmul.f32 %v1492_v47, %v827_v44  ;;  %v843_v51 = vadd.f32 %v1485_v42, %v807_v45  ;;  %v779_v52 = vld [vmem:[#allocation2 + $0xd8] sm:$0xff]  ;;  %745 = vst.msk [vmem:[#allocation2 + $0xe0] sm:$0xff] %vm347_vm3, %v712_v34 }
  0xc3   : > { %v950_v53 = vsel %vm882_vm0, %v850_v39, %v918_v48  ;;  %vm867_vm2 = vcmp.ge.f32.partialorder %v835_v49, 0.0  ;;  %v903_v54 = vmul.f32 %v1492_v47, %v835_v49  ;;  %v815_v55 = vmul.f32 %v1480_v35, %v779_v52  ;;  %v756_v56 = vld [vmem:[#allocation2 + $0x20] sm:$0xff]  ;;  %722 = vst.msk [vmem:[#allocation2 + $0x28] sm:$0xff] %vm347_vm3, %v689_v43  ;;  %v387_v48 = vld [vmem:[#allocation2 + $0x38] sm:$0xff] }
  0xc4   : > { %v982_v59 = vpack.c.bf16 %v950_v53, %v950_v53  ;;  %v927_v60 = vsel %vm859_vm1, %v827_v44, %v895_v50  ;;  %vm875_vm4 = vcmp.ge.f32.partialorder %v843_v51, 0.0  ;;  %v911_v61 = vmul.f32 %v1492_v47, %v843_v51  ;;  %730 = vst.msk [vmem:[#allocation2 + $0x68] sm:$0xff] %vm347_vm3, %v697_v46 }
  0xc5   : > { %v959_v62 = vpack.c.bf16 %v927_v60, %v927_v60  ;;  %v935_v63 = vsel %vm867_vm2, %v835_v49, %v903_v54  ;;  %v851_v0 = vadd.f32 %v1485_v42, %v815_v55  ;;  %v792_v1 = vmul.f32 %v1480_v35, %v756_v56  ;;  %v656_v2 = vpop.f32.mrf.mxu2  ;;  %v676_v3 = vpop.f32.mrf.mxu3 }
  0xc6   : > { %1015 = vst.msk [vmem:[%s1507_s16 + $0x68] sm:$0xf] %vm988_vm6, %v982_v59  ;;  %v967_v4 = vpack.c.bf16 %v935_v63, %v935_v63  ;;  %v943_v5 = vsel %vm875_vm4, %v843_v51, %v911_v61  ;;  %v764_v6 = vld [vmem:[#allocation2 + $0x60] sm:$0xff]  ;;  %v705_v7 = vadd.f32 %v656_v2, %v401_v57  ;;  %v713_v8 = vadd.f32 %v676_v3, %v409_v58  ;;  %v619_v10 = vpop.f32.mrf.mxu0  ;;  %v639_v15 = vpop.f32.mrf.mxu1  ;;  %v395_v59 = vld [vmem:[#allocation2 + $0x78] sm:$0xff] }
  0xc7   : > { %992 = vst.msk [vmem:[%s1507_s16 + $0xc] sm:$0xf] %vm988_vm6, %v959_v62  ;;  %v975_v11 = vpack.c.bf16 %v943_v5, %v943_v5  ;;  %vm883_vm5 = vcmp.ge.f32.partialorder %v851_v0, 0.0  ;;  %v919_v12 = vmul.f32 %v1492_v47, %v851_v0  ;;  %v828_v13 = vadd.f32 %v1485_v42, %v792_v1  ;;  %v772_v14 = vld [vmem:[#allocation2 + $0xa0] sm:$0xff]  ;;  %v411_v5 = vld [vmem:[#allocation2 + $0xf8] sm:$0xff] }
  0xc8   : > { %1000 = vst.msk [vmem:[%s1507_s16 + $0x2c] sm:$0xf] %vm988_vm6, %v967_v4  ;;  %v800_v16 = vmul.f32 %v1480_v35, %v764_v6  ;;  %v808_v17 = vmul.f32 %v1480_v35, %v772_v14  ;;  %v690_v22 = vadd.f32 %v619_v10, %v386_v9  ;;  %v698_v31 = vadd.f32 %v639_v15, %v394_v18  ;;  %v403_v4 = vld [vmem:[#allocation2 + $0xb8] sm:$0xff] }
  0xc9   : > { %1008 = vst.msk [vmem:[%s1507_s16 + $0x4c] sm:$0xf] %vm988_vm6, %v975_v11  ;;  %v951_v19 = vsel %vm883_vm5, %v851_v0, %v919_v12  ;;  %vm860_vm7 = vcmp.ge.f32.partialorder %v828_v13, 0.0  ;;  %v896_v20 = vmul.f32 %v1492_v47, %v828_v13  ;;  %v780_v21 = vld [vmem:[#allocation2 + $0xe0] sm:$0xff] }
  0xca   : > { %v983_v23 = vpack.c.bf16 %v951_v19, %v951_v19  ;;  %v836_v24 = vadd.f32 %v1485_v42, %v800_v16  ;;  %v844_v25 = vadd.f32 %v1485_v42, %v808_v17  ;;  %v816_v26 = vmul.f32 %v1480_v35, %v780_v21  ;;  %v757_v27 = vld [vmem:[#allocation2 + $0x28] sm:$0xff]  ;;  %738 = vst.msk [vmem:[#allocation2 + $0xa8] sm:$0xff] %vm347_vm3, %v705_v7 }
  0xcb   : > { %v928_v28 = vsel %vm860_vm7, %v828_v13, %v896_v20  ;;  %v793_v29 = vmul.f32 %v1480_v35, %v757_v27  ;;  %v765_v30 = vld [vmem:[#allocation2 + $0x68] sm:$0xff]  ;;  %746 = vst.msk [vmem:[#allocation2 + $0xe8] sm:$0xff] %vm347_vm3, %v713_v8 }
  0xcc   : > { %1016 = vst.msk [vmem:[%s1507_s16 + $0x6c] sm:$0xf] %vm988_vm6, %v983_v23  ;;  %v960_v34 = vpack.c.bf16 %v928_v28, %v928_v28  ;;  %vm868_vm8 = vcmp.ge.f32.partialorder %v836_v24, 0.0  ;;  %v904_v36 = vmul.f32 %v1492_v47, %v836_v24  ;;  %vm876_vm9 = vcmp.ge.f32.partialorder %v844_v25, 0.0 }
  0xcd   : > { %v912_v37 = vmul.f32 %v1492_v47, %v844_v25  ;;  %v852_v38 = vadd.f32 %v1485_v42, %v816_v26  ;;  %v829_v39 = vadd.f32 %v1485_v42, %v793_v29  ;;  %v801_v40 = vmul.f32 %v1480_v35, %v765_v30  ;;  %723 = vst.msk [vmem:[#allocation2 + $0x30] sm:$0xff] %vm347_vm3, %v690_v22  ;;  %v659_v41 = vpop.f32.mrf.mxu2  ;;  %v679_v43 = vpop.f32.mrf.mxu3 }
  0xce   : > { %993 = vst.msk [vmem:[%s1507_s16 + $0x10] sm:$0xf] %vm988_vm6, %v960_v34  ;;  %v936_v44 = vsel %vm868_vm8, %v836_v24, %v904_v36  ;;  %v706_v45 = vadd.f32 %v659_v41, %v402_v32  ;;  %v714_v46 = vadd.f32 %v679_v43, %v410_v33  ;;  %v621_v49 = vpop.f32.mrf.mxu0  ;;  %v641_v60 = vpop.f32.mrf.mxu1 }
  0xcf   : > { %v968_v50 = vpack.c.bf16 %v936_v44, %v936_v44  ;;  %v944_v51 = vsel %vm876_vm9, %v844_v25, %v912_v37  ;;  %vm884_vm10 = vcmp.ge.f32.partialorder %v852_v38, 0.0  ;;  %v920_v52 = vmul.f32 %v1492_v47, %v852_v38  ;;  %731 = vst.msk [vmem:[#allocation2 + $0x70] sm:$0xff] %vm347_vm3, %v698_v31 }
  0xd0   : > { %v976_v53 = vpack.c.bf16 %v944_v51, %v944_v51  ;;  %vm861_vm11 = vcmp.ge.f32.partialorder %v829_v39, 0.0  ;;  %v897_v54 = vmul.f32 %v1492_v47, %v829_v39  ;;  %v837_v55 = vadd.f32 %v1485_v42, %v801_v40  ;;  %739 = vst.msk [vmem:[#allocation2 + $0xb0] sm:$0xff] %vm347_vm3, %v706_v45 }
  0xd1   : > { %1001 = vst.msk [vmem:[%s1507_s16 + $0x30] sm:$0xf] %vm988_vm6, %v968_v50  ;;  %v952_v56 = vsel %vm884_vm10, %v852_v38, %v920_v52  ;;  %v773_v57 = vld [vmem:[#allocation2 + $0xa8] sm:$0xff]  ;;  %v691_v58 = vadd.f32 %v621_v49, %v387_v48  ;;  %v699_v8 = vadd.f32 %v641_v60, %v395_v59 }
  0xd2   : > { %1009 = vst.msk [vmem:[%s1507_s16 + $0x50] sm:$0xf] %vm988_vm6, %v976_v53  ;;  %v984_v61 = vpack.c.bf16 %v952_v56, %v952_v56  ;;  %v929_v62 = vsel %vm861_vm11, %v829_v39, %v897_v54  ;;  %vm869_vm12 = vcmp.ge.f32.partialorder %v837_v55, 0.0  ;;  %v905_v63 = vmul.f32 %v1492_v47, %v837_v55  ;;  %v781_v0 = vld [vmem:[#allocation2 + $0xe8] sm:$0xff] }
  0xd3   : > { %v961_v1 = vpack.c.bf16 %v929_v62, %v929_v62  ;;  %v809_v2 = vmul.f32 %v1480_v35, %v773_v57  ;;  %v817_v3 = vmul.f32 %v1480_v35, %v781_v0  ;;  %747 = vst.msk [vmem:[#allocation2 + $0xf0] sm:$0xff] %vm347_vm3, %v714_v46 }
  0xd4   : > { %1017 = vst.msk [vmem:[%s1507_s16 + $0x70] sm:$0xf] %vm988_vm6, %v984_v61  ;;  %v937_v6 = vsel %vm869_vm12, %v837_v55, %v905_v63  ;;  %v758_v7 = vld [vmem:[#allocation2 + $0x30] sm:$0xff] }
  0xd5   : > { %994 = vst.msk [vmem:[%s1507_s16 + $0x14] sm:$0xf] %vm988_vm6, %v961_v1  ;;  %v969_v9 = vpack.c.bf16 %v937_v6, %v937_v6  ;;  %v845_v10 = vadd.f32 %v1485_v42, %v809_v2  ;;  %v853_v11 = vadd.f32 %v1485_v42, %v817_v3  ;;  %v794_v12 = vmul.f32 %v1480_v35, %v758_v7  ;;  %v661_v13 = vpop.f32.mrf.mxu2  ;;  %v681_v14 = vpop.f32.mrf.mxu3 }
  0xd6   : > { %v766_v15 = vld [vmem:[#allocation2 + $0x70] sm:$0xff]  ;;  %724 = vst.msk [vmem:[#allocation2 + $0x38] sm:$0xff] %vm347_vm3, %v691_v58  ;;  %v707_v16 = vadd.f32 %v661_v13, %v403_v4  ;;  %v715_v17 = vadd.f32 %v681_v14, %v411_v5 }
  0xd7   : > { %1002 = vst.msk [vmem:[%s1507_s16 + $0x34] sm:$0xf] %vm988_vm6, %v969_v9  ;;  %vm877_vm13 = vcmp.ge.f32.partialorder %v845_v10, 0.0  ;;  %v913_v18 = vmul.f32 %v1492_v47, %v845_v10  ;;  %vm885_vm14 = vcmp.ge.f32.partialorder %v853_v11, 0.0  ;;  %v921_v19 = vmul.f32 %v1492_v47, %v853_v11  ;;  %v774_v20 = vld [vmem:[#allocation2 + $0xb0] sm:$0xff] }
  0xd8   : > { %v830_v21 = vadd.f32 %v1485_v42, %v794_v12  ;;  %v802_v22 = vmul.f32 %v1480_v35, %v766_v15  ;;  %v810_v23 = vmul.f32 %v1480_v35, %v774_v20  ;;  %732 = vst.msk [vmem:[#allocation2 + $0x78] sm:$0xff] %vm347_vm3, %v699_v8 }
  0xd9   : > { %v945_v24 = vsel %vm877_vm13, %v845_v10, %v913_v18  ;;  %v953_v25 = vsel %vm885_vm14, %v853_v11, %v921_v19  ;;  %740 = vst.msk [vmem:[#allocation2 + $0xb8] sm:$0xff] %vm347_vm3, %v707_v16 }
  0xda   : > { %v977_v26 = vpack.c.bf16 %v945_v24, %v945_v24  ;;  %v985_v27 = vpack.c.bf16 %v953_v25, %v953_v25  ;;  %vm862_vm15 = vcmp.ge.f32.partialorder %v830_v21, 0.0  ;;  %v898_v28 = vmul.f32 %v1492_v47, %v830_v21  ;;  %v782_v29 = vld [vmem:[#allocation2 + $0xf0] sm:$0xff]  ;;  %748 = vst.msk [vmem:[#allocation2 + $0xf8] sm:$0xff] %vm347_vm3, %v715_v17 }
  0xdb   : > { %v838_v30 = vadd.f32 %v1485_v42, %v802_v22  ;;  %v846_v31 = vadd.f32 %v1485_v42, %v810_v23  ;;  %v818_v32 = vmul.f32 %v1480_v35, %v782_v29 }
  0xdc   : > { %1010 = vst.msk [vmem:[%s1507_s16 + $0x54] sm:$0xf] %vm988_vm6, %v977_v26  ;;  %v930_v33 = vsel %vm862_vm15, %v830_v21, %v898_v28 }
  0xdd   : > { %1018 = vst.msk [vmem:[%s1507_s16 + $0x74] sm:$0xf] %vm988_vm6, %v985_v27  ;;  %v962_v34 = vpack.c.bf16 %v930_v33, %v930_v33  ;;  %vm870_vm0 = vcmp.ge.f32.partialorder %v838_v30, 0.0  ;;  %v906_v36 = vmul.f32 %v1492_v47, %v838_v30  ;;  %vm878_vm1 = vcmp.ge.f32.partialorder %v846_v31, 0.0  ;;  %v759_v37 = vld [vmem:[#allocation2 + $0x38] sm:$0xff] }
  0xde   : > { %v914_v38 = vmul.f32 %v1492_v47, %v846_v31  ;;  %v854_v39 = vadd.f32 %v1485_v42, %v818_v32  ;;  %v795_v40 = vmul.f32 %v1480_v35, %v759_v37 }
  0xdf   : > { %995 = vst.msk [vmem:[%s1507_s16 + $0x18] sm:$0xf] %vm988_vm6, %v962_v34  ;;  %v938_v41 = vsel %vm870_vm0, %v838_v30, %v906_v36  ;;  %v767_v43 = vld [vmem:[#allocation2 + $0x78] sm:$0xff] }
  0xe0   : > { %v970_v44 = vpack.c.bf16 %v938_v41, %v938_v41  ;;  %v946_v45 = vsel %vm878_vm1, %v846_v31, %v914_v38  ;;  %vm886_vm3 = vcmp.ge.f32.partialorder %v854_v39, 0.0  ;;  %v922_v46 = vmul.f32 %v1492_v47, %v854_v39  ;;  %v775_v48 = vld [vmem:[#allocation2 + $0xb8] sm:$0xff] }
  0xe1   : > { %v978_v49 = vpack.c.bf16 %v946_v45, %v946_v45  ;;  %v831_v50 = vadd.f32 %v1485_v42, %v795_v40  ;;  %v803_v51 = vmul.f32 %v1480_v35, %v767_v43  ;;  %v811_v52 = vmul.f32 %v1480_v35, %v775_v48  ;;  %v783_v53 = vld [vmem:[#allocation2 + $0xf8] sm:$0xff] }
  0xe2   : > { %1003 = vst.msk [vmem:[%s1507_s16 + $0x38] sm:$0xf] %vm988_vm6, %v970_v44  ;;  %v954_v54 = vsel %vm886_vm3, %v854_v39, %v922_v46  ;;  %v819_v55 = vmul.f32 %v1480_v35, %v783_v53 }
  0xe3   : > { %1011 = vst.msk [vmem:[%s1507_s16 + $0x58] sm:$0xf] %vm988_vm6, %v978_v49  ;;  %v986_v56 = vpack.c.bf16 %v954_v54, %v954_v54  ;;  %vm863_vm2 = vcmp.ge.f32.partialorder %v831_v50, 0.0  ;;  %v899_v57 = vmul.f32 %v1492_v47, %v831_v50  ;;  %v839_v58 = vadd.f32 %v1485_v42, %v803_v51 }
  0xe4   : > { %v847_v59 = vadd.f32 %v1485_v42, %v811_v52  ;;  %v855_v60 = vadd.f32 %v1485_v42, %v819_v55 }
  0xe5   : > { %1019 = vst.msk [vmem:[%s1507_s16 + $0x78] sm:$0xf] %vm988_vm6, %v986_v56  ;;  %v931_v61 = vsel %vm863_vm2, %v831_v50, %v899_v57  ;;  %vm871_vm4 = vcmp.ge.f32.partialorder %v839_v58, 0.0  ;;  %v907_v35 = vmul.f32 %v1492_v47, %v839_v58 }
  0xe6   : > { %v963_v62 = vpack.c.bf16 %v931_v61, %v931_v61  ;;  %vm879_vm5 = vcmp.ge.f32.partialorder %v847_v59, 0.0  ;;  %v915_v63 = vmul.f32 %v1492_v47, %v847_v59  ;;  %vm887_vm7 = vcmp.ge.f32.partialorder %v855_v60, 0.0 }
  0xe7   : > { %v939_v0 = vsel %vm871_vm4, %v839_v58, %v907_v35  ;;  %v923_v1 = vmul.f32 %v1492_v47, %v855_v60 }
  0xe8   : > { %996 = vst.msk [vmem:[%s1507_s16 + $0x1c] sm:$0xf] %vm988_vm6, %v963_v62  ;;  %v971_v42 = vpack.c.bf16 %v939_v0, %v939_v0  ;;  %v947_v2 = vsel %vm879_vm5, %v847_v59, %v915_v63 }
  0xe9   : > { %v979_v3 = vpack.c.bf16 %v947_v2, %v947_v2  ;;  %v955_v4 = vsel %vm887_vm7, %v855_v60, %v923_v1 }
  0xea   : > { %1004 = vst.msk [vmem:[%s1507_s16 + $0x3c] sm:$0xf] %vm988_vm6, %v971_v42  ;;  %v987_v5 = vpack.c.bf16 %v955_v4, %v955_v4 }
  0xeb   : > { %1012 = vst.msk [vmem:[%s1507_s16 + $0x5c] sm:$0xf] %vm988_vm6, %v979_v3 }
  0xec   : > { %1020 = vst.msk [vmem:[%s1507_s16 + $0x7c] sm:$0xf] %vm988_vm6, %v987_v5 }
  0xed PF: > { %s15_s20 = sadd.s32 1, %s1340_s20   ;;  %s1704_s18 = smov %s1336_s19 }
  0xee   : > { %p12_p5 = scmp.ge.s32.totalorder %s15_s20, 4   ;;  %s1705_s19 = smov %s1707_s21 }
  0xf0   :  { %14 = sbr.rel (!%p12_p5) target bundleno = 2 (0x2), region = 90 }

</bundles_post_ra>
